<compile_context>
chip_gen: v5e
topology: v5e:2x2
jax: 0.10.0
libtpu: 0.0.40
codegen_flags: <defaults>
</compile_context>

<pallas_src>
import jax
import jax.numpy as jnp
from jax.experimental import pallas as pl
from jax.experimental.pallas import tpu as pltpu

EPS = float(jnp.finfo(jnp.float32).eps)  # matches torch.finfo(torch.float32).eps


def _rope_tables(seq_len, dim_emb, base=10000, eps=EPS):
    """cos table and sign-baked sin table.

    rotate_half(x) == roll(x, dim_emb//2, axis=-1) * sign with
    sign = [-1]*half + [+1]*(dim_emb-half), hence
    x*cos + rotate_half(x)*sin == x*cos + roll(x, half)*(sign*sin).
    """
    idx = jnp.arange(seq_len, dtype=jnp.float32)
    scale = 1.0 / (base ** (jnp.arange(0, dim_emb, 2, dtype=jnp.float32) / dim_emb) + eps)
    position = jnp.outer(idx, scale)                      # (S, D//2)
    position = jnp.concatenate([position, position], -1)  # (S, D)
    cos = jnp.cos(position)
    sin = jnp.sin(position)
    half = dim_emb // 2
    sign = jnp.concatenate(
        [-jnp.ones((half,), jnp.float32), jnp.ones((dim_emb - half,), jnp.float32)])
    return cos, sin * sign[None, :]


def _make_rope_kernel(dim_emb):
    half = dim_emb // 2

    def kernel(x_ref, cos_ref, sin_ref, o_ref):
        x = x_ref[...]              # (nb, sb, D) f32
        cos = cos_ref[...]          # (sb, D)
        sin_signed = sin_ref[...]   # (sb, D), sign already baked in
        # rotate_half via one lane rotation on the XLU (no concat / copies).
        rot = pltpu.roll(x, shift=half, axis=2)
        o_ref[...] = x * cos[None, :, :] + rot * sin_signed[None, :, :]

    return kernel


def _pick_block(dim, target, align):
    """Largest block <= target (aligned to `align`) that tiles `dim` cleanly."""
    if dim <= target:
        return dim
    b = (target // align) * align
    while b >= align:
        if dim % b == 0:
            return b
        b -= align
    return dim  # fall back to the full (untiled) dimension


def rotary_positional_encoding(x, *, base=10000):
    """x: (B, H, S, D) float32 -> RoPE(x), same shape (matches PyTorch forward)."""
    B, H, S, D = x.shape
    assert D % 2 == 0, "RoPE requires an even embedding dimension"
    x = x.astype(jnp.float32)
    cos, sin_signed = _rope_tables(S, D, base=base)

    N = B * H
    x2 = x.reshape(N, S, D)

    # Seq block: full if small, else a multiple of 8 that divides S (<= 512 rows).
    sb = _pick_block(S, 512, 8)
    # Row (batch*head) block: fold rows per step up to ~2 MiB of f32 per x block.
    row_bytes = sb * D * 4
    nb = _pick_block(N, max(1, (2 << 20) // row_bytes), 1)

    grid = (N // nb, S // sb)

    out = pl.pallas_call(
        _make_rope_kernel(D),
        out_shape=jax.ShapeDtypeStruct((N, S, D), jnp.float32),
        grid_spec=pltpu.PrefetchScalarGridSpec(
            num_scalar_prefetch=0,
            grid=grid,
            in_specs=[
                pl.BlockSpec((nb, sb, D), lambda n, s: (n, s, 0)),  # x rows
                pl.BlockSpec((sb, D), lambda n, s: (s, 0)),         # cos (constant in n)
                pl.BlockSpec((sb, D), lambda n, s: (s, 0)),         # signed sin
            ],
            out_specs=pl.BlockSpec((nb, sb, D), lambda n, s: (n, s, 0)),
        ),
        compiler_params=pltpu.CompilerParams(
            dimension_semantics=("parallel", "parallel")),
    )(x2, cos, sin_signed)

    return out.reshape(B, H, S, D)


def _reference(x, *, base=10000):
    """Pure-JAX mirror of the PyTorch forward (slice + negate + concat form)."""
    _, _, S, D = x.shape
    idx = jnp.arange(S, dtype=jnp.float32)
    scale = 1.0 / (base ** (jnp.arange(0, D, 2, dtype=jnp.float32) / D) + EPS)
    position = jnp.outer(idx, scale)
    position = jnp.concatenate([position, position], -1)
    cos = jnp.cos(position)[None, None]
    sin = jnp.sin(position)[None, None]
    x1, xh2 = x[..., : D // 2], x[..., D // 2:]
    rot = jnp.concatenate([-xh2, x1], axis=-1)
    return x * cos + rot * sin


if __name__ == "__main__":
    # (batch, heads, seq_len, dim_emb) — dim_emb=128 keeps the last dim lane-dense.
    B, H, S, D = 2, 4, 16, 128

    key = jax.random.PRNGKey(0)
    x = jax.random.normal(key, (B, H, S, D), dtype=jnp.float32)

    out = rotary_positional_encoding(x)
    out = jax.block_until_ready(out)

    ref = _reference(x)
    assert out.shape == (B, H, S, D)
    assert jnp.allclose(out, ref, rtol=1e-5, atol=1e-5), "mismatch vs JAX reference"

    print("KERNEL_OK")
</pallas_src>

<mosaic_0001>
module attributes {stable_mosaic.version = 11 : i64} {
  func.func @kernel(%arg0: i32, %arg1: i32, %arg2: memref<8x16x128xf32, #tpu.memory_space<vmem>>, %arg3: memref<16x128xf32, #tpu.memory_space<vmem>>, %arg4: memref<16x128xf32, #tpu.memory_space<vmem>>, %arg5: memref<8x16x128xf32, #tpu.memory_space<vmem>>) attributes {dimension_semantics = [#tpu.dimension_semantics<parallel>, #tpu.dimension_semantics<parallel>], iteration_bounds = array<i64: 1, 1>, scalar_prefetch = 0 : i64, scratch_operands = 0 : i64, tpu.core_type = #tpu.core_type<tc>, window_params = [{transform_indices = @transform_0, window_bounds = array<i64: 8, 16, 128>}, {transform_indices = @transform_1, window_bounds = array<i64: 16, 128>}, {transform_indices = @transform_2, window_bounds = array<i64: 16, 128>}, {transform_indices = @transform_3, window_bounds = array<i64: 8, 16, 128>}]} {
    %c0 = arith.constant 0 : index
    %c0_0 = arith.constant 0 : index
    %c0_1 = arith.constant 0 : index
    %0 = vector.load %arg2[%c0, %c0_0, %c0_1] : memref<8x16x128xf32, #tpu.memory_space<vmem>>, vector<8x16x128xf32>
    %c0_2 = arith.constant 0 : index
    %c0_3 = arith.constant 0 : index
    %1 = vector.load %arg3[%c0_2, %c0_3] : memref<16x128xf32, #tpu.memory_space<vmem>>, vector<16x128xf32>
    %c0_4 = arith.constant 0 : index
    %c0_5 = arith.constant 0 : index
    %2 = vector.load %arg4[%c0_4, %c0_5] : memref<16x128xf32, #tpu.memory_space<vmem>>, vector<16x128xf32>
    %c64_i32 = arith.constant 64 : i32
    %3 = tpu.dynamic_rotate %0 by %c64_i32 dim 2 : vector<8x16x128xf32>, i32 -> vector<8x16x128xf32>
    %4 = vector.shape_cast %1 : vector<16x128xf32> to vector<1x16x128xf32>
    %5 = vector.broadcast %4 : vector<1x16x128xf32> to vector<8x16x128xf32>
    %6 = arith.mulf %0, %5 : vector<8x16x128xf32>
    %7 = vector.shape_cast %2 : vector<16x128xf32> to vector<1x16x128xf32>
    %8 = vector.broadcast %7 : vector<1x16x128xf32> to vector<8x16x128xf32>
    %9 = arith.mulf %3, %8 : vector<8x16x128xf32>
    %10 = arith.addf %6, %9 : vector<8x16x128xf32>
    %c0_6 = arith.constant 0 : index
    %c0_7 = arith.constant 0 : index
    %c0_8 = arith.constant 0 : index
    %11 = vector.load %arg5[%c0_6, %c0_7, %c0_8] : memref<8x16x128xf32, #tpu.memory_space<vmem>>, vector<8x16x128xf32>
    tpu.vector_store %arg5[%c0_6, %c0_7, %c0_8], %10 {strides = array<i32>} : memref<8x16x128xf32, #tpu.memory_space<vmem>>, vector<8x16x128xf32>,
    return
  }
  func.func @transform_0(%arg0: i32, %arg1: i32) -> (i32, i32, i32) {
    %c0_i32 = arith.constant 0 : i32
    %c0_i32_0 = arith.constant 0 : i32
    return %arg0, %arg1, %c0_i32 : i32, i32, i32
  }
  func.func @transform_1(%arg0: i32, %arg1: i32) -> (i32, i32) {
    %c0_i32 = arith.constant 0 : i32
    %c0_i32_0 = arith.constant 0 : i32
    return %arg1, %c0_i32 : i32, i32
  }
  func.func @transform_2(%arg0: i32, %arg1: i32) -> (i32, i32) {
    %c0_i32 = arith.constant 0 : i32
    %c0_i32_0 = arith.constant 0 : i32
    return %arg1, %c0_i32 : i32, i32
  }
  func.func @transform_3(%arg0: i32, %arg1: i32) -> (i32, i32, i32) {
    %c0_i32 = arith.constant 0 : i32
    %c0_i32_0 = arith.constant 0 : i32
    return %arg0, %arg1, %c0_i32 : i32, i32, i32
  }
}

</mosaic_0001>

<bundles_post_ra>
// kernel: tpu_custom_call.1
= control target key start
LH: loop header
LB: loop body
LE: loop exit
PB: predicated region body
PF: predicated region fallthrough
CT: control target
= control target key end

     0   :  { %8 = vsyncpa [#allocation3], 0  ;;  %s426_s0 = inlined_call_operand.hbm [shape: f32[8,16,128], index: 0, kind: input, shape index: {}]   ;;  %s427_s1 = inlined_call_operand.hbm [shape: f32[16,128], index: 1, kind: input, shape index: {}]   ;;  %s428_s2 = inlined_call_operand.hbm [shape: f32[16,128], index: 2, kind: input, shape index: {}]   ;;  %s429_s3 = inlined_call_operand.hbm [shape: f32[8,16,128], index: 3, kind: output, shape index: {}]  }
   0x1   :  { %9 = vsyncpa [#allocation6], 0 }
   0x2   :  { %10 = vsyncpa [#allocation4], 0  ;;  %s28_s14 = sshll.u32 %s427_s1, 4  ;;  %s307_s15 = smov [#allocation5]   ;;  %s29_s14 = int_to_ptr.hbm [resolvable:$true] %s28_s14 }
   0x3   :  { %s30_s16 = sshll.u32 %s307_s15, 4  ;;  %s15_s19 = sshll.u32 %s426_s0, 4  ;;  %s31_s16 = int_to_ptr.vmem [resolvable:$true] %s30_s16  ;;  %s16_s19 = int_to_ptr.hbm [resolvable:$true] %s15_s19 }
   0x4   :  { %s308_s20 = smov 128   ;;  %s309_s21 = smov 8  }
   0x5   :  { %36 = dma.hbm_to_vmem [thread:$0]  %s29_s14, 256, %s31_s16, [#allocation6], %s308_s20, %s308_s20, %s309_s21  }
   0x6   :  { %s310_s22 = smov [#allocation2]   ;;  %s41_s1 = sshll.u32 %s428_s2, 4  ;;  %s42_s1 = int_to_ptr.hbm [resolvable:$true] %s41_s1 }
   0x7   :  { %s17_s23 = sshll.u32 %s310_s22, 4  ;;  %s311_s0 = smov [#allocation7]   ;;  %s18_s23 = int_to_ptr.vmem [resolvable:$true] %s17_s23 }
   0x8   :  { %23 = dma.hbm_to_vmem [thread:$0]  %s16_s19, 2048, %s18_s23, [#allocation3], %s308_s20, %s308_s20, %s309_s21  }
   0x9   :  { %s43_s26 = sshll.u32 %s311_s0, 4  ;;  %s44_s26 = int_to_ptr.vmem [resolvable:$true] %s43_s26 }
   0xa   :  { %49 = dma.hbm_to_vmem [thread:$0]  %s42_s1, 256, %s44_s26, [#allocation6], %s308_s20, %s308_s20, %s309_s21  }
   0xb   :  { %301 = dma.done.wait [#allocation3], 2048  }
   0xc   :  { %302 = vsyncadd [#allocation3], 4294965248 }
   0xd   :  { %303 = dma.done.wait [#allocation6], 512  }
   0xe   :  { %304 = vsyncadd [#allocation6], 4294966784  ;;  %v62_v0 = vld [vmem:[#allocation2] sm:$0xff]  ;;  %v64_v1 = vld [vmem:[#allocation2 + $0x10] sm:$0xff]  ;;  %s312_s2 = smov 64   ;;  %s313_s27 = smov [#allocation8]  }
   0xf   :  { %82 = vrot.lane.b32.xlu0 %v62_v0, %s312_s2  ;;  %86 = vrot.lane.b32.xlu1 %v64_v1, %s312_s2  ;;  %v66_v2 = vld [vmem:[#allocation2 + $0x20] sm:$0xff]  ;;  %v63_v3 = vld [vmem:[#allocation2 + $0x8] sm:$0xff]  ;;  %v65_v4 = vld [vmem:[#allocation2 + $0x18] sm:$0xff]  ;;  %s182_s28 = sshll.u32 %s313_s27, 4  ;;  %s184_s4 = sshll.u32 %s429_s3, 4  ;;  %s183_s28 = int_to_ptr.vmem [resolvable:$true] %s182_s28  ;;  %s185_s4 = int_to_ptr.hbm [resolvable:$true] %s184_s4 }
  0x10   :  { %90 = vrot.lane.b32.xlu2 %v66_v2, %s312_s2  ;;  %v67_v5 = vld [vmem:[#allocation2 + $0x28] sm:$0xff]  ;;  %v352_v6 = vld [vmem:[#allocation2 + $0x30] sm:$0xff]  ;;  %v354_v7 = vld [vmem:[#allocation2 + $0x38] sm:$0xff] }
  0x11   :  { %v70_v8 = vld [vmem:[#allocation2 + $0x40] sm:$0xff]  ;;  %v358_v9 = vld [vmem:[#allocation2 + $0x48] sm:$0xff]  ;;  %v360_v10 = vld [vmem:[#allocation2 + $0x50] sm:$0xff] }
  0x12   :  { %v73_v11 = vld [vmem:[#allocation2 + $0x58] sm:$0xff]  ;;  %v364_v12 = vld [vmem:[#allocation2 + $0x60] sm:$0xff]  ;;  %v366_v13 = vld [vmem:[#allocation2 + $0x68] sm:$0xff] }
  0x13   :  { %v76_v14 = vld [vmem:[#allocation2 + $0x70] sm:$0xff]  ;;  %v370_v15 = vld [vmem:[#allocation2 + $0x78] sm:$0xff]  ;;  %v373_v16 = vld [vmem:[#allocation5] sm:$0xff] }
  0x14   :  { %v118_v17 = vmul.f32 %v373_v16, %v66_v2  ;;  %v376_v18 = vld [vmem:[#allocation7] sm:$0xff]  ;;  %v379_v22 = vld [vmem:[#allocation5 + $0x8] sm:$0xff]  ;;  %v382_v24 = vld [vmem:[#allocation7 + $0x8] sm:$0xff]  ;;  %v122_v28 = vmul.f32 %v373_v16, %v70_v8  ;;  %v114_v32 = vmul.f32 %v373_v16, %v62_v0  ;;  %v116_v33 = vmul.f32 %v373_v16, %v64_v1 }
  0x15   :  { %v119_v23 = vmul.f32 %v379_v22, %v67_v5  ;;  %v125_v38 = vmul.f32 %v379_v22, %v73_v11  ;;  %v115_v44 = vmul.f32 %v379_v22, %v63_v3  ;;  %v117_v45 = vmul.f32 %v379_v22, %v65_v4 }
  0x16   :  { %v128_v50 = vmul.f32 %v373_v16, %v76_v14  ;;  %v120_v56 = vmul.f32 %v373_v16, %v352_v6  ;;  %v121_v57 = vmul.f32 %v379_v22, %v354_v7  ;;  %v123_v0 = vmul.f32 %v379_v22, %v358_v9 }
  0x17   :  { %84 = vrot.lane.b32.xlu0 %v63_v3, %s312_s2  ;;  %88 = vrot.lane.b32.xlu1 %v65_v4, %s312_s2  ;;  %v124_v1 = vmul.f32 %v373_v16, %v360_v10 }
  0x18   :  { %92 = vrot.lane.b32.xlu2 %v67_v5, %s312_s2 }
  0x1f   :  { %94 = vrot.lane.b32.xlu0 %v352_v6, %s312_s2  ;;  %96 = vrot.lane.b32.xlu1 %v354_v7, %s312_s2 }
  0x20   :  { %98 = vrot.lane.b32.xlu2 %v70_v8, %s312_s2  ;;  %v126_v8 = vmul.f32 %v373_v16, %v364_v12 }
  0x27   :  { %100 = vrot.lane.b32.xlu0 %v358_v9, %s312_s2  ;;  %102 = vrot.lane.b32.xlu1 %v360_v10, %s312_s2 }
  0x28   :  { %104 = vrot.lane.b32.xlu2 %v73_v11, %s312_s2  ;;  %v127_v11 = vmul.f32 %v379_v22, %v366_v13 }
  0x2f   :  { %106 = vrot.lane.b32.xlu0 %v364_v12, %s312_s2  ;;  %108 = vrot.lane.b32.xlu1 %v366_v13, %s312_s2 }
  0x30   :  { %110 = vrot.lane.b32.xlu2 %v76_v14, %s312_s2 }
  0x37   :  { %112 = vrot.lane.b32.xlu0 %v370_v15, %s312_s2 }
  0x6a   :  { %v91_v19 = vpop.permute.xlu2 %90 }
  0x6b   :  { %v134_v20 = vmul.f32 %v91_v19, %v376_v18 }
  0x6d   :  { %v150_v21 = vadd.f32 %v134_v20, %v118_v17 }
  0x6f   :  { %166 = vst [vmem:[#allocation8 + $0x20] sm:$0xff] %v150_v21  ;;  %v129_v21 = vmul.f32 %v379_v22, %v370_v15 }
  0x72   :  { %v93_v25 = vpop.permute.xlu2 %92 }
  0x73   :  { %v135_v26 = vmul.f32 %v93_v25, %v382_v24 }
  0x75   :  { %v151_v27 = vadd.f32 %v135_v26, %v119_v23 }
  0x77   :  { %167 = vst [vmem:[#allocation8 + $0x28] sm:$0xff] %v151_v27 }
  0x7a   :  { %v99_v29 = vpop.permute.xlu2 %98 }
  0x7b   :  { %v138_v30 = vmul.f32 %v99_v29, %v376_v18 }
  0x7d   :  { %v154_v31 = vadd.f32 %v138_v30, %v122_v28 }
  0x7f   :  { %170 = vst [vmem:[#allocation8 + $0x40] sm:$0xff] %v154_v31 }
  0x81   :  { %v83_v34 = vpop.permute.xlu0 %82  ;;  %v87_v35 = vpop.permute.xlu1 %86 }
  0x82   :  { %v130_v36 = vmul.f32 %v83_v34, %v376_v18  ;;  %v132_v37 = vmul.f32 %v87_v35, %v376_v18  ;;  %v105_v41 = vpop.permute.xlu2 %104 }
  0x83   :  { %v141_v42 = vmul.f32 %v105_v41, %v382_v24 }
  0x84   :  { %v146_v39 = vadd.f32 %v130_v36, %v114_v32  ;;  %v148_v40 = vadd.f32 %v132_v37, %v116_v33 }
  0x85   :  { %v157_v43 = vadd.f32 %v141_v42, %v125_v38 }
  0x86   :  { %162 = vst [vmem:[#allocation8] sm:$0xff] %v146_v39 }
  0x87   :  { %164 = vst [vmem:[#allocation8 + $0x10] sm:$0xff] %v148_v40 }
  0x88   :  { %173 = vst [vmem:[#allocation8 + $0x58] sm:$0xff] %v157_v43 }
  0x89   :  { %v85_v46 = vpop.permute.xlu0 %84  ;;  %v89_v47 = vpop.permute.xlu1 %88 }
  0x8a   :  { %v131_v48 = vmul.f32 %v85_v46, %v382_v24  ;;  %v133_v49 = vmul.f32 %v89_v47, %v382_v24  ;;  %v111_v53 = vpop.permute.xlu2 %110 }
  0x8b   :  { %v144_v54 = vmul.f32 %v111_v53, %v376_v18 }
  0x8c   :  { %v147_v51 = vadd.f32 %v131_v48, %v115_v44  ;;  %v149_v52 = vadd.f32 %v133_v49, %v117_v45 }
  0x8d   :  { %v160_v55 = vadd.f32 %v144_v54, %v128_v50 }
  0x8e   :  { %163 = vst [vmem:[#allocation8 + $0x8] sm:$0xff] %v147_v51 }
  0x8f   :  { %165 = vst [vmem:[#allocation8 + $0x18] sm:$0xff] %v149_v52 }
  0x90   :  { %176 = vst [vmem:[#allocation8 + $0x70] sm:$0xff] %v160_v55 }
  0x91   :  { %v95_v58 = vpop.permute.xlu0 %94  ;;  %v97_v59 = vpop.permute.xlu1 %96 }
  0x92   :  { %v136_v60 = vmul.f32 %v95_v58, %v376_v18  ;;  %v137_v61 = vmul.f32 %v97_v59, %v382_v24 }
  0x94   :  { %v152_v62 = vadd.f32 %v136_v60, %v120_v56  ;;  %v153_v63 = vadd.f32 %v137_v61, %v121_v57 }
  0x96   :  { %168 = vst [vmem:[#allocation8 + $0x30] sm:$0xff] %v152_v62 }
  0x97   :  { %169 = vst [vmem:[#allocation8 + $0x38] sm:$0xff] %v153_v63 }
  0x99   :  { %v101_v2 = vpop.permute.xlu0 %100  ;;  %v103_v3 = vpop.permute.xlu1 %102 }
  0x9a   :  { %v139_v4 = vmul.f32 %v101_v2, %v382_v24  ;;  %v140_v5 = vmul.f32 %v103_v3, %v376_v18 }
  0x9c   :  { %v155_v6 = vadd.f32 %v139_v4, %v123_v0  ;;  %v156_v7 = vadd.f32 %v140_v5, %v124_v1 }
  0x9e   :  { %171 = vst [vmem:[#allocation8 + $0x48] sm:$0xff] %v155_v6 }
  0x9f   :  { %172 = vst [vmem:[#allocation8 + $0x50] sm:$0xff] %v156_v7 }
  0xa1   :  { %v107_v9 = vpop.permute.xlu0 %106  ;;  %v109_v14 = vpop.permute.xlu1 %108 }
  0xa2   :  { %v142_v10 = vmul.f32 %v107_v9, %v376_v18  ;;  %v143_v17 = vmul.f32 %v109_v14, %v382_v24 }
  0xa4   :  { %v158_v19 = vadd.f32 %v142_v10, %v126_v8  ;;  %v159_v20 = vadd.f32 %v143_v17, %v127_v11 }
  0xa6   :  { %174 = vst [vmem:[#allocation8 + $0x60] sm:$0xff] %v158_v19 }
  0xa7   :  { %175 = vst [vmem:[#allocation8 + $0x68] sm:$0xff] %v159_v20 }
  0xa9   :  { %v113_v23 = vpop.permute.xlu0 %112 }
  0xaa   :  { %v145_v12 = vmul.f32 %v113_v23, %v382_v24 }
  0xac   :  { %v161_v13 = vadd.f32 %v145_v12, %v129_v21 }
  0xae   :  { %177 = vst [vmem:[#allocation8 + $0x78] sm:$0xff] %v161_v13 }
  0xaf   :  { %190 = dma.vmem_to_hbm [thread:$0]  %s183_s28, 2048, %s185_s4, [#allocation4], %s308_s20, %s308_s20, %s309_s21  }
  0xb0   :  { %305 = dma.done.wait [#allocation4], 2048  }
  0xb1   :  { %306 = vsyncadd [#allocation4], 4294965248 }
  0xb2   :  { %195 = vsyncpa [#allocation3], 1 }
  0xb3   :  { %196 = vsyncpa [#allocation6], 1 }
  0xb4   :  { %197 = vsyncpa [#allocation4], 1 }

</bundles_post_ra>
